<compile_context>
chip_gen: v7x
topology: tpu7x:2x2x1
jax: 0.10.0
libtpu: 0.0.40
codegen_flags: <defaults>
</compile_context>

<pallas_src>
import math

import numpy as np
import jax
import jax.numpy as jnp
from jax import lax
from jax.experimental import pallas as pl
from jax.experimental.pallas import tpu as pltpu

KLEN = 21
PAD = 10  # (KLEN - 1) // 2


def gauss_kernel(kernlen=21, nsig=3, channels=1):
    """Numpy port of the reference gauss_kernel (scipy.stats.norm.cdf via erf)."""
    interval = (2 * nsig + 1.0) / kernlen
    x = np.linspace(-nsig - interval / 2.0, nsig + interval / 2.0, kernlen + 1)
    cdf = np.array([0.5 * (1.0 + math.erf(v / math.sqrt(2.0))) for v in x],
                   dtype=np.float64)
    kern1d = np.diff(cdf)
    kernel_raw = np.sqrt(np.outer(kern1d, kern1d))
    kernel = kernel_raw / kernel_raw.sum()
    out_filter = np.array(kernel, dtype=np.float32)
    out_filter = out_filter.reshape((kernlen, kernlen, 1, 1))
    out_filter = np.repeat(out_filter, channels, axis=2)
    return out_filter  # (kernlen, kernlen, channels, 1)


def make_blur_weight(nc):
    """Equivalent of Blur.__init__: weight of shape (nc, 1, 21, 21)."""
    k = gauss_kernel(kernlen=KLEN, nsig=3, channels=nc)       # (21, 21, nc, 1)
    w = np.transpose(k, (2, 3, 0, 1))                         # (nc, 1, 21, 21)
    return jnp.asarray(w, dtype=jnp.float32)


def _banded(g, n):
    """(n, n) banded matrix M with M[i, r] = g[r - i + PAD] inside the band.

    With zero `same` padding of width PAD, the 21-tap 1D convolution along an
    axis of length n is exactly `M @ x`: taps that would land in the pad
    region are simply absent from the truncated band."""
    idx = jnp.arange(n)
    off = idx[None, :] - idx[:, None] + PAD          # off[i, r] = r - i + PAD
    valid = (off >= 0) & (off < KLEN)
    return jnp.where(valid, g[jnp.clip(off, 0, KLEN - 1)],
                     0.0).astype(jnp.float32)


def _blur_kernel(a_ref, b_ref, x_ref, o_ref):
    # a_ref: VMEM (H, H)    vertical-tap banded matrix   (out = A @ x)
    # b_ref: VMEM (W, W)    horizontal-tap banded matrix (out = x @ B)
    # x_ref: VMEM (C, H, W) input planes for one batch element
    # o_ref: VMEM (C, H, W) output planes
    C, H, W = x_ref.shape
    a = a_ref[...]
    b = b_ref[...]

    if H % 8 == 0:
        # Horizontal pass: fold (C, H) into the matmul M dimension -> one tall
        # MXU matmul for all channels (layout-preserving reshape: H % 8 == 0).
        x = x_ref[...]
        t = jnp.dot(x.reshape(C * H, W), b, preferred_element_type=jnp.float32)
        t = t.reshape(C, H, W)
        # Vertical pass: per-channel (H, H) @ (H, W).  C is known at trace
        # time and small, so a statically unrolled loop issuing one MXU
        # matmul per channel is cheap and layout-friendly (leading-dim slice).
        for c in range(C):
            o_ref[c] = jnp.dot(a, t[c],
                               preferred_element_type=jnp.float32
                               ).astype(o_ref.dtype)
    else:
        # Fallback: fully per-channel (no reshape), still all-MXU.
        for c in range(C):
            t = jnp.dot(x_ref[c], b, preferred_element_type=jnp.float32)
            o_ref[c] = jnp.dot(a, t,
                               preferred_element_type=jnp.float32
                               ).astype(o_ref.dtype)


def blur(x, weight):
    """Depthwise 21x21 conv, stride 1, padding 10 (== F.conv2d(..., groups=nc)).

    x      : (N, C, H, W) float32
    weight : (C, 1, 21, 21) float32 (same Gaussian filter repeated per channel,
             exactly as produced by gauss_kernel / Blur.__init__)
    """
    N, C, H, W = x.shape
    if weight.shape != (C, 1, KLEN, KLEN):
        raise RuntimeError(
            'The channel of input [%d] does not match the preset channel [%d]'
            % (C, weight.shape[0]))

    # Exact separability: kernel = outer(g, g), g = sqrt(diag(kernel)).
    # gauss_kernel repeats one filter per channel, so a single (A, B) pair
    # serves every channel.
    g = jnp.sqrt(jnp.diagonal(weight[0, 0]))                  # (21,)
    a_mat = _banded(g, H)                                     # (H, H), left-mul
    b_mat = _banded(g, W).T                                    # (W, W), right-mul

    # TODO(synk): for multi-megapixel planes, tile H with a 2*PAD halo so the
    # double-buffered (C, H, W) blocks fit v7x's 64 MiB VMEM.
    return pl.pallas_call(
        _blur_kernel,
        out_shape=jax.ShapeDtypeStruct((N, C, H, W), x.dtype),
        grid_spec=pltpu.PrefetchScalarGridSpec(
            num_scalar_prefetch=0,
            grid=(N,),
            in_specs=[
                # Same block every step -> fetched once, stays VMEM-resident.
                pl.BlockSpec((H, H), lambda n: (0, 0)),
                pl.BlockSpec((W, W), lambda n: (0, 0)),
                pl.BlockSpec((pl.Squeezed(), C, H, W), lambda n: (n, 0, 0, 0)),
            ],
            out_specs=pl.BlockSpec((pl.Squeezed(), C, H, W),
                                   lambda n: (n, 0, 0, 0)),
        ),
        compiler_params=pltpu.CompilerParams(
            dimension_semantics=("parallel",)),
    )(a_mat, b_mat, x)


def _reference_blur(x, weight):
    """Pure-JAX reference (matches F.conv2d(x, w, stride=1, padding=10, groups=C))."""
    C = x.shape[1]
    return lax.conv_general_dilated(
        x, weight,
        window_strides=(1, 1),
        padding=((PAD, PAD), (PAD, PAD)),
        dimension_numbers=("NCHW", "OIHW", "NCHW"),
        feature_group_count=C,
    )


if __name__ == "__main__":
    N, C, H, W = 2, 4, 16, 16
    key = jax.random.PRNGKey(0)
    x = jax.random.normal(key, (N, C, H, W), dtype=jnp.float32)

    weight = make_blur_weight(C)          # (C, 1, 21, 21), non-trainable buffer

    out = jax.block_until_ready(blur(x, weight))
    ref = jax.block_until_ready(_reference_blur(x, weight))

    assert out.shape == (N, C, H, W)
    np.testing.assert_allclose(np.asarray(out), np.asarray(ref),
                               rtol=1e-4, atol=1e-5)

    print("KERNEL_OK")
</pallas_src>

<mosaic_0001>
module attributes {stable_mosaic.version = 11 : i64} {
  func.func @_blur_kernel(%arg0: i32, %arg1: memref<16x16xf32, #tpu.memory_space<vmem>>, %arg2: memref<16x16xf32, #tpu.memory_space<vmem>>, %arg3: memref<1x4x16x16xf32, #tpu.memory_space<vmem>>, %arg4: memref<1x4x16x16xf32, #tpu.memory_space<vmem>>) attributes {dimension_semantics = [#tpu.dimension_semantics<parallel>], iteration_bounds = array<i64: 2>, scalar_prefetch = 0 : i64, scratch_operands = 0 : i64, tpu.core_type = #tpu.core_type<tc>, window_params = [{pipeline_mode = #tpu.pipeline_mode<synchronous>, transform_indices = @transform_0, window_bounds = array<i64: 16, 16>}, {pipeline_mode = #tpu.pipeline_mode<synchronous>, transform_indices = @transform_1, window_bounds = array<i64: 16, 16>}, {transform_indices = @transform_2, window_bounds = array<i64: 1, 4, 16, 16>}, {transform_indices = @transform_3, window_bounds = array<i64: 1, 4, 16, 16>}]} {
    %c0 = arith.constant 0 : index
    %c0_0 = arith.constant 0 : index
    %0 = vector.load %arg1[%c0, %c0_0] : memref<16x16xf32, #tpu.memory_space<vmem>>, vector<16x16xf32>
    %c0_1 = arith.constant 0 : index
    %c0_2 = arith.constant 0 : index
    %1 = vector.load %arg2[%c0_1, %c0_2] : memref<16x16xf32, #tpu.memory_space<vmem>>, vector<16x16xf32>
    %c0_3 = arith.constant 0 : index
    %c0_4 = arith.constant 0 : index
    %c0_5 = arith.constant 0 : index
    %c0_6 = arith.constant 0 : index
    %2 = vector.load %arg3[%c0_3, %c0_4, %c0_5, %c0_6] : memref<1x4x16x16xf32, #tpu.memory_space<vmem>>, vector<1x4x16x16xf32>
    %3 = vector.shape_cast %2 : vector<1x4x16x16xf32> to vector<4x16x16xf32>
    %4 = vector.shape_cast %3 : vector<4x16x16xf32> to vector<64x16xf32>
    %cst = arith.constant dense<0.000000e+00> : vector<64x16xf32>
    %5 = tpu.matmul %4, %1, %cst {dimension_numbers = #tpu.dot_dimension_numbers<[1], [0], [0], [1], [0, 0, 1, 1], [], []>} : vector<64x16xf32>, vector<16x16xf32>, vector<64x16xf32> -> vector<64x16xf32>
    %6 = vector.shape_cast %5 : vector<64x16xf32> to vector<4x16x16xf32>
    %7 = vector.extract_strided_slice %6 {offsets = [0, 0, 0], sizes = [1, 16, 16], strides = [1, 1, 1]} : vector<4x16x16xf32> to vector<1x16x16xf32>
    %8 = vector.shape_cast %7 : vector<1x16x16xf32> to vector<16x16xf32>
    %cst_7 = arith.constant dense<0.000000e+00> : vector<16x16xf32>
    %9 = tpu.matmul %0, %8, %cst_7 {dimension_numbers = #tpu.dot_dimension_numbers<[1], [0], [0], [1], [0, 0, 1, 1], [], []>} : vector<16x16xf32>, vector<16x16xf32>, vector<16x16xf32> -> vector<16x16xf32>
    %c0_8 = arith.constant 0 : index
    %c0_9 = arith.constant 0 : index
    %c0_10 = arith.constant 0 : index
    %c0_11 = arith.constant 0 : index
    %10 = vector.load %arg4[%c0_8, %c0_9, %c0_10, %c0_11] : memref<1x4x16x16xf32, #tpu.memory_space<vmem>>, vector<1x1x16x16xf32>
    %11 = vector.shape_cast %10 : vector<1x1x16x16xf32> to vector<16x16xf32>
    %12 = vector.shape_cast %9 : vector<16x16xf32> to vector<1x1x16x16xf32>
    tpu.vector_store %arg4[%c0_8, %c0_9, %c0_10, %c0_11], %12 {strides = array<i32>} : memref<1x4x16x16xf32, #tpu.memory_space<vmem>>, vector<1x1x16x16xf32>,
    %13 = vector.extract_strided_slice %6 {offsets = [1, 0, 0], sizes = [1, 16, 16], strides = [1, 1, 1]} : vector<4x16x16xf32> to vector<1x16x16xf32>
    %14 = vector.shape_cast %13 : vector<1x16x16xf32> to vector<16x16xf32>
    %cst_12 = arith.constant dense<0.000000e+00> : vector<16x16xf32>
    %15 = tpu.matmul %0, %14, %cst_12 {dimension_numbers = #tpu.dot_dimension_numbers<[1], [0], [0], [1], [0, 0, 1, 1], [], []>} : vector<16x16xf32>, vector<16x16xf32>, vector<16x16xf32> -> vector<16x16xf32>
    %c0_13 = arith.constant 0 : index
    %c1 = arith.constant 1 : index
    %c0_14 = arith.constant 0 : index
    %c0_15 = arith.constant 0 : index
    %16 = vector.load %arg4[%c0_13, %c1, %c0_14, %c0_15] : memref<1x4x16x16xf32, #tpu.memory_space<vmem>>, vector<1x1x16x16xf32>
    %17 = vector.shape_cast %16 : vector<1x1x16x16xf32> to vector<16x16xf32>
    %18 = vector.shape_cast %15 : vector<16x16xf32> to vector<1x1x16x16xf32>
    tpu.vector_store %arg4[%c0_13, %c1, %c0_14, %c0_15], %18 {strides = array<i32>} : memref<1x4x16x16xf32, #tpu.memory_space<vmem>>, vector<1x1x16x16xf32>,
    %19 = vector.extract_strided_slice %6 {offsets = [2, 0, 0], sizes = [1, 16, 16], strides = [1, 1, 1]} : vector<4x16x16xf32> to vector<1x16x16xf32>
    %20 = vector.shape_cast %19 : vector<1x16x16xf32> to vector<16x16xf32>
    %cst_16 = arith.constant dense<0.000000e+00> : vector<16x16xf32>
    %21 = tpu.matmul %0, %20, %cst_16 {dimension_numbers = #tpu.dot_dimension_numbers<[1], [0], [0], [1], [0, 0, 1, 1], [], []>} : vector<16x16xf32>, vector<16x16xf32>, vector<16x16xf32> -> vector<16x16xf32>
    %c0_17 = arith.constant 0 : index
    %c2 = arith.constant 2 : index
    %c0_18 = arith.constant 0 : index
    %c0_19 = arith.constant 0 : index
    %22 = vector.load %arg4[%c0_17, %c2, %c0_18, %c0_19] : memref<1x4x16x16xf32, #tpu.memory_space<vmem>>, vector<1x1x16x16xf32>
    %23 = vector.shape_cast %22 : vector<1x1x16x16xf32> to vector<16x16xf32>
    %24 = vector.shape_cast %21 : vector<16x16xf32> to vector<1x1x16x16xf32>
    tpu.vector_store %arg4[%c0_17, %c2, %c0_18, %c0_19], %24 {strides = array<i32>} : memref<1x4x16x16xf32, #tpu.memory_space<vmem>>, vector<1x1x16x16xf32>,
    %25 = vector.extract_strided_slice %6 {offsets = [3, 0, 0], sizes = [1, 16, 16], strides = [1, 1, 1]} : vector<4x16x16xf32> to vector<1x16x16xf32>
    %26 = vector.shape_cast %25 : vector<1x16x16xf32> to vector<16x16xf32>
    %cst_20 = arith.constant dense<0.000000e+00> : vector<16x16xf32>
    %27 = tpu.matmul %0, %26, %cst_20 {dimension_numbers = #tpu.dot_dimension_numbers<[1], [0], [0], [1], [0, 0, 1, 1], [], []>} : vector<16x16xf32>, vector<16x16xf32>, vector<16x16xf32> -> vector<16x16xf32>
    %c0_21 = arith.constant 0 : index
    %c3 = arith.constant 3 : index
    %c0_22 = arith.constant 0 : index
    %c0_23 = arith.constant 0 : index
    %28 = vector.load %arg4[%c0_21, %c3, %c0_22, %c0_23] : memref<1x4x16x16xf32, #tpu.memory_space<vmem>>, vector<1x1x16x16xf32>
    %29 = vector.shape_cast %28 : vector<1x1x16x16xf32> to vector<16x16xf32>
    %30 = vector.shape_cast %27 : vector<16x16xf32> to vector<1x1x16x16xf32>
    tpu.vector_store %arg4[%c0_21, %c3, %c0_22, %c0_23], %30 {strides = array<i32>} : memref<1x4x16x16xf32, #tpu.memory_space<vmem>>, vector<1x1x16x16xf32>,
    return
  }
  func.func @transform_0(%arg0: i32) -> (i32, i32) {
    %c0_i32 = arith.constant 0 : i32
    %c0_i32_0 = arith.constant 0 : i32
    %c0_i32_1 = arith.constant 0 : i32
    return %c0_i32, %c0_i32_0 : i32, i32
  }
  func.func @transform_1(%arg0: i32) -> (i32, i32) {
    %c0_i32 = arith.constant 0 : i32
    %c0_i32_0 = arith.constant 0 : i32
    %c0_i32_1 = arith.constant 0 : i32
    return %c0_i32, %c0_i32_0 : i32, i32
  }
  func.func @transform_2(%arg0: i32) -> (i32, i32, i32, i32) {
    %c0_i32 = arith.constant 0 : i32
    %c0_i32_0 = arith.constant 0 : i32
    %c0_i32_1 = arith.constant 0 : i32
    %c0_i32_2 = arith.constant 0 : i32
    return %arg0, %c0_i32, %c0_i32_0, %c0_i32_1 : i32, i32, i32, i32
  }
  func.func @transform_3(%arg0: i32) -> (i32, i32, i32, i32) {
    %c0_i32 = arith.constant 0 : i32
    %c0_i32_0 = arith.constant 0 : i32
    %c0_i32_1 = arith.constant 0 : i32
    %c0_i32_2 = arith.constant 0 : i32
    return %arg0, %c0_i32, %c0_i32_0, %c0_i32_1 : i32, i32, i32, i32
  }
}

</mosaic_0001>

<bundles_post_ra>
// kernel: tpu_custom_call.1
= control target key start
LH: loop header
LB: loop body
LE: loop exit
PB: predicated region body
PF: predicated region fallthrough
CT: control target
= control target key end

     0   :  { %8 = vsyncpa [#allocation3], 0  ;;  %s1443_s0 = inlined_call_operand.hbm [shape: f32[16,16], index: 0, kind: input, shape index: {}]   ;;  %s1444_s1 = inlined_call_operand.hbm [shape: f32[16,16], index: 1, kind: input, shape index: {}]   ;;  %s1445_s2 = inlined_call_operand.hbm [shape: f32[2,4,16,16], index: 2, kind: input, shape index: {}]   ;;  %s1446_s3 = inlined_call_operand.hbm [shape: f32[2,4,16,16], index: 3, kind: output, shape index: {}]  }
   0x1   :  { %9 = vsyncpa [#allocation6], 0 }
   0x2   :  { %10 = vsyncpa [#allocation4], 0 }
   0x3   :  { %12 = vsyncpa [#allocation4 + $0x1], 0  ;;  %s1174_s12 = smov 0   ;;  %s1176_s13 = smov 0  }
   0x4   :  { %s1178_s14 = smov 0   ;;  %s1180_s15 = smov 0  }
   0x5 LB: > { %s1195_s16 = sadd.s32 4294967295, %s1144_s15   ;;  %s781_s17 = sadd.s32 4294967294, %s1144_s15   ;;  %s1144_s15 = sphi %s1180_s15, %s1474_s15   ;;  %s1140_s14 = sphi %s1178_s14, %s1473_s14   ;;  %s1136_s13 = sphi %s1176_s13, %s1472_s13   ;;  %s1132_s12 = sphi %s1174_s12, %s1471_s12  }
   0x6   : > { %s1199_s18 = sadd.s32 1, %s1144_s15   ;;  %s67_s19 = sadd.s32 1, %s1140_s14 }
   0x7   : > { %s64_s20 = ssub.s32 %s1144_s15, %s1199_s18  ;;  %p74_p0 = scmp.ne.s32.totalorder %s1140_s14, %s1136_s13 }
   0x8   : > { %p65_p1 = scmp.eq.s32.totalorder %s64_s20, 0  ;;  %p75_p2 = scmp.eq.s32.totalorder %s1144_s15, 0 }
   0x9   : > { %p80_p3 = scmp.ne.s32.totalorder %s1136_s13, %s1132_s12  ;;  %p1447_p4 = scmp.eq.s32.totalorder %s1195_s16, 0 }
   0xa   : > { %s1211_s21 = scalar_select %p65_p1, %s1140_s14, %s67_s19  }
   0xb   : > { %p1213_p5 = por %p75_p2, %p74_p0  ;;  %p1219_p6 = por %p1447_p4, %p80_p3 }
   0xc   : > { %p104_p7 = scmp.eq.s32.totalorder %s1195_s16, 1  ;;  %p110_p8 = scmp.eq.s32.totalorder %s781_s17, 1 }
   0xd   : > { %s1452_s22 = scalar_select %p1213_p5, 1, 0 }
   0xe   : > { %s1453_s23 = scalar_select %p1219_p6, 1, 0 }
   0xf   : > { %p782_p9 = scmp.ge.s32.totalorder %s1144_s15, 1  ;;  %p117_p10 = scmp.lt.s32.totalorder %s1144_s15, 3 }
  0x10   : > { %p1226_p11 = por %p104_p7, %p74_p0  ;;  %p1230_p12 = por %p110_p8, %p80_p3 }
  0x11   : > { %p1234_p13 = pnand %p782_p9, %p117_p10  ;;  %s1146_s27 = smov [#allocation2]  }
  0x12   : > { %s1454_s24 = scalar_select %p1226_p11, 1, 0 }
  0x13   : > { %s1455_s25 = scalar_select %p1230_p12, 1, 0 }
  0x14   : > { %s1456_s26 = scalar_select %p1234_p13, 1, 0 }
  0x15   : > { %p925_p1 = pneg %p1234_p13  ;;  %s129_s28 = sshll.u32 %s1146_s27, 4  ;;  %s130_s28 = int_to_ptr.vmem [resolvable:$true] %s129_s28 }
  0x16   : > { %s1147_s30 = smov [#allocation5]   ;;  %s984_s7 = scalar_lea.hbm %s1443_s0, 256 }
  0x17   : > { %p1242_p2 = pnand %p925_p1, %p1447_p4  ;;  %s142_s4 = sshll.u32 %s1147_s30, 4  ;;  %s143_s4 = int_to_ptr.vmem [resolvable:$true] %s142_s4 }
  0x18   : > { %p985_p7 = scmp.ne.s32.totalorder %s1443_s0, %s984_s7  ;;  %p991_p1 = scmp.lt.u32.totalorder %s984_s7, %s1443_s0 }
  0x19   : > { %p986_p8 = pneg %p1242_p2 }
  0x1b   : > { %p987_p9 = pnand %p986_p8, %p985_p7 }
  0x1d   : > { %p988_p10 = pneg %p987_p9 }
  0x1f   : > { %p993_p0 = pnand %p991_p1, %p988_p10 }
  0x21   : > { %996 = shalt.err (!%p993_p0)
}
  0x22   : > { %s997_s17 = scalar_lea.vmem %s130_s28, 256  ;;  %p1005_p11 = scmp.lt.s32.totalorder %s130_s28, %s130_s28 }
  0x23   : > { %p998_p4 = scmp.ne.s32.totalorder %s130_s28, %s997_s17  ;;  %p1006_p6 = scmp.lt.s32.totalorder %s997_s17, %s997_s17 }
  0x25   : > { %p1000_p3 = pnand %p998_p4, %p986_p8  ;;  %p1007_p13 = por %p1006_p6, %p1005_p11 }
  0x27   : > { %p1001_p12 = pneg %p1000_p3 }
  0x29   : > { %p1008_p5 = pnand %p1007_p13, %p1001_p12 }
  0x2b   : > { %1011 = shalt.err (!%p1008_p5)
}
  0x2c   : > { %s1148_s19 = smov 128   ;;  %s1149_s20 = smov 8  }
  0x2d   : > { %928 = dma.hbm_to_vmem [thread:$0]  (!%p1242_p2), %s1443_s0, 256, %s130_s28, [#allocation3], %s1148_s19, %s1148_s19, %s1149_s20  }
  0x2e   : > { %p1458_p4 = scmp.ne.s32.totalorder %s1452_s22, 0  ;;  %p1459_p0 = scmp.lt.s32.totalorder %s1144_s15, 2 }
  0x2f   : > { %s1012_s8 = scalar_lea.hbm %s1444_s1, 256 }
  0x30   : > { %p1277_p3 = pnand %p1459_p0, %p1458_p4  ;;  %p1013_p5 = scmp.ne.s32.totalorder %s1444_s1, %s1012_s8 }
  0x31   : > { %p1019_p12 = scmp.lt.u32.totalorder %s1012_s8, %s1444_s1 }
  0x32   : > { %s1460_s5 = scalar_select %p1277_p3, 1, 0 }
  0x33   : > { %p1015_p6 = pnand %p1013_p5, %p986_p8 }
  0x35   : > { %p1016_p11 = pneg %p1015_p6 }
  0x37   : > { %p1021_p13 = pnand %p1019_p12, %p1016_p11 }
  0x39   : > { %1024 = shalt.err (!%p1021_p13)
}
  0x3a   : > { %s1025_s11 = scalar_lea.vmem %s143_s4, 256  ;;  %p1033_p1 = scmp.lt.s32.totalorder %s143_s4, %s143_s4 }
  0x3b   : > { %p1026_p7 = scmp.ne.s32.totalorder %s143_s4, %s1025_s11  ;;  %p1034_p4 = scmp.lt.s32.totalorder %s1025_s11, %s1025_s11 }
  0x3d   : > { %p1028_p9 = pnand %p1026_p7, %p986_p8  ;;  %p1035_p0 = por %p1034_p4, %p1033_p1 }
  0x3f   : > { %p1029_p10 = pneg %p1028_p9 }
  0x41   : > { %p1036_p3 = pnand %p1035_p0, %p1029_p10 }
  0x43   : > { %1039 = shalt.err (!%p1036_p3)
}
  0x44   : > { %931 = dma.hbm_to_vmem [thread:$0]  (!%p1242_p2), %s1444_s1, 256, %s143_s4, [#allocation6], %s1148_s19, %s1148_s19, %s1149_s20  }
  0x45   : > { %s156_s30 = sand.u32 1, %s1144_s15   ;;  %s158_s6 = sand.u32 1, %s1140_s14  }
  0x46   : > { %s786_s7 = sshll.u32 %s158_s6, 6  ;;  %s821_s8 = sshll.u32 %s1144_s15, 10 }
  0x47   : > { %s1310_s29 = scalar_lea.hbm %s1445_s2, %s821_s8  ;;  %s160_s28 = scalar_lea.vmem [#allocation7], %s786_s7 }
  0x48   : > { %s167_s22 = sshll.u32 %s160_s28, 4  ;;  %s1314_s11 = scalar_lea.sflag [#allocation3], %s156_s30  ;;  %s1312_s22 = int_to_ptr.vmem [resolvable:$true] %s167_s22 }
  0x49   : > { %s1040_s4 = scalar_lea.hbm %s1310_s29, 1024  ;;  %p1461_p8 = scmp.ne.s32.totalorder %s1460_s5, 0 }
  0x4a   : > { %p1041_p2 = scmp.ne.s32.totalorder %s1310_s29, %s1040_s4  ;;  %s1045_s6 = scalar_lea.hbm %s1445_s2, 2048 }
  0x4b   : > { %p1042_p3 = pneg %p1461_p8  ;;  %p1046_p11 = scmp.lt.u32.totalorder %s1310_s29, %s1445_s2 }
  0x4c   : > { %p1047_p12 = scmp.lt.u32.totalorder %s1045_s6, %s1040_s4  ;;  %p1049_p7 = scmp.lt.u32.totalorder %s1040_s4, %s1310_s29 }
  0x4d   : > { %p1043_p5 = pnand %p1042_p3, %p1041_p2 }
  0x4e   : > { %p1048_p13 = por %p1047_p12, %p1046_p11 }
  0x4f   : > { %p1044_p6 = pneg %p1043_p5 }
  0x50   : > { %p1050_p9 = por %p1049_p7, %p1048_p13 }
  0x52   : > { %p1051_p10 = pnand %p1050_p9, %p1044_p6 }
  0x54   : > { %1054 = shalt.err (!%p1051_p10)
}
  0x55   : > { %s1055_s30 = scalar_lea.vmem %s1312_s22, 1024  ;;  %s1150_s7 = smov [#allocation7]  }
  0x56   : > { %p1056_p1 = scmp.ne.s32.totalorder %s1312_s22, %s1055_s30  ;;  %s1060_s10 = sshll.u32 %s1150_s7, 4  ;;  %s1061_s10 = int_to_ptr.vmem [resolvable:$false] %s1060_s10 }
  0x57   : > { %s1062_s28 = scalar_lea.vmem %s1061_s10, 2048  ;;  %p1063_p2 = scmp.lt.s32.totalorder %s1312_s22, %s1061_s10 }
  0x58   : > { %p1058_p4 = pnand %p1056_p1, %p1042_p3  ;;  %p1064_p5 = scmp.lt.s32.totalorder %s1062_s28, %s1055_s30 }
  0x5a   : > { %p1059_p0 = pneg %p1058_p4  ;;  %p1065_p11 = por %p1064_p5, %p1063_p2 }
  0x5c   : > { %p1066_p12 = pnand %p1065_p11, %p1059_p0 }
  0x5e   : > { %1069 = shalt.err (!%p1066_p12)
}
  0x5f   : > { %935 = dma.hbm_to_vmem [thread:$0]  (!%p1461_p8), %s1310_s29, 1024, %s1312_s22, %s1314_s11, %s1148_s19, %s1148_s19, %s1149_s20  }
  0x60   : > { %p1462_p3 = scmp.ne.s32.totalorder %s1456_s26, 0 }
  0x61   : > { %p1463_p6 = scmp.eq.s32.totalorder (!%p1462_p3), %s1195_s16, 0 }
  0x62   : > { %179 = sbr.rel (%p1462_p3) target bundleno = 580 (0x244), region = 32 }
  0x69   : > { %1115 = dma.done.wait (%p1463_p6), [#allocation3], 256   ;;  %p1464_p13 = pmov %p1463_p6 }
  0x6a   : > { %p1465_p7 = pmov %p1463_p6 }
  0x6b   : > { %1117 = vsyncadd (%p1464_p13), [#allocation3], 4294967040 }
  0x6c   : > { %1119 = dma.done.wait (%p1465_p7), [#allocation6], 256   ;;  %p1466_p9 = pmov %p1463_p6 }
  0x6d   : > { %s189_s19 = sand.u32 1, %s1195_s16   ;;  %s191_s20 = sand.u32 1, %s1136_s13  }
  0x6e   : > { %1121 = vsyncadd (%p1466_p9), [#allocation6], 4294967040  ;;  %s1359_s26 = sshll.u32 %s191_s20, 6  ;;  %s190_s5 = scalar_lea.sflag [#allocation3], %s189_s19 }
  0x6f   : > { %s193_s29 = scalar_lea.vmem [#allocation7], %s1359_s26  ;;  %p1467_p8 = scmp.ne.s32.totalorder %s1453_s23, 0 }
  0x71   : > { %1123 = dma.done.wait (%p1467_p8), %s190_s5, 1024  }
  0x72   : > { %1125 = vsyncadd (%p1467_p8), %s190_s5, 4294966272  ;;  %vm228_vm0 = vcmask 130048   ;;  %v218_v0 = vld [vmem:[#allocation5] sm:$0xff]  ;;  %v219_v1 = vld [vmem:[#allocation5 + $0x8] sm:$0xff]  ;;  %s215_s23 = scalar_lea.vmem [#allocation8], %s1359_s26  ;;  %s822_s11 = sshll.u32 %s1195_s16, 10 }
  0x73   : > { %v220_v2 = vld [vmem:[%s193_s29] sm:$0xff]  ;;  %v893_v3 = vpack.c.bf16 %v219_v1, %v218_v0  ;;  %v221_v4 = vld [vmem:[%s193_s29 + $0x8] sm:$0xff]  ;;  %v222_v5 = vld [vmem:[%s193_s29 + $0x10] sm:$0xff]  ;;  %s689_s22 = sshll.u32 %s215_s23, 4  ;;  %s1395_s27 = scalar_lea.hbm %s1446_s3, %s822_s11  ;;  %s1389_s22 = int_to_ptr.vmem [resolvable:$true] %s689_s22 }
  0x74   : > { %853 = vmatprep.mubr.msk.f32.mxu0 %vm228_vm0, %v220_v2  ;;  %v223_v6 = vld [vmem:[%s193_s29 + $0x18] sm:$0xff]  ;;  %v224_v7 = vld [vmem:[%s193_s29 + $0x20] sm:$0xff]  ;;  %v225_v8 = vld [vmem:[%s193_s29 + $0x28] sm:$0xff]  ;;  %s1401_s16 = scalar_lea.sflag [#allocation4], %s191_s20  ;;  %s1070_s6 = scalar_lea.vmem %s1389_s22, 1024 }
  0x75   : > { %894 = vmatprep.subr.bf16.mxu0 %v893_v3  ;;  %v226_v9 = vld [vmem:[%s193_s29 + $0x30] sm:$0xff]  ;;  %v227_v10 = vld [vmem:[%s193_s29 + $0x38] sm:$0xff]  ;;  %v216_v11 = vld [vmem:[#allocation2] sm:$0xff]  ;;  %p1071_p10 = scmp.ne.s32.totalorder %s1389_s22, %s1070_s6  ;;  %p1468_p1 = scmp.ne.s32.totalorder %s1454_s24, 0 }
  0x76   : > { %896 = vmatpush3.bf16.msra.mxu0 %v893_v3  ;;  %869 = vmatprep.mubr.msk.f32.mxu1 %vm228_vm0, %v216_v11  ;;  %v217_v17 = vld [vmem:[#allocation2 + $0x8] sm:$0xff]  ;;  %s1151_s8 = smov [#allocation8]  }
  0x77   : > { %p1072_p4 = pnand %p1071_p10, %p1468_p1  ;;  %s1074_s9 = sshll.u32 %s1151_s8, 4  ;;  %s1075_s9 = int_to_ptr.vmem [resolvable:$false] %s1074_s9 }
  0x78   : > { %s1076_s30 = scalar_lea.vmem %s1075_s9, 2048  ;;  %p1077_p2 = scmp.lt.s32.totalorder %s1389_s22, %s1075_s9 }
  0x79   : > { %854 = vmatmul.mubr.msk.f32.vlgmr.msra.gmra.mrb[0].mxu0 %vm228_vm0, %v221_v4  ;;  %p1073_p0 = pneg %p1072_p4  ;;  %p1078_p5 = scmp.lt.s32.totalorder %s1076_s30, %s1070_s6 }
  0x7a   : > { %856 = vmatprep.mubr.msk.f32.mxu0 %vm228_vm0, %v222_v5 }
  0x7b   : > { %p1079_p11 = por %p1078_p5, %p1077_p2 }
  0x7d   : > { %857 = vmatmul.mubr.msk.f32.gmra.mrb[2].mxu0 %vm228_vm0, %v223_v6  ;;  %p1080_p12 = pnand %p1079_p11, %p1073_p0 }
  0x7e   : > { %859 = vmatprep.mubr.msk.f32.mxu0 %vm228_vm0, %v224_v7 }
  0x81   : > { %860 = vmatmul.mubr.msk.f32.gmra.mrb[4].mxu0 %vm228_vm0, %v225_v8 }
  0x82   : > { %862 = vmatprep.mubr.msk.f32.mxu0 %vm228_vm0, %v226_v9 }
  0x85   : > { %863 = vmatmul.mubr.msk.f32.gmra.mrb[6].mxu0 %vm228_vm0, %v227_v10 }
 0x14c   : > { %v855_v12 = vpop.f32.mrb[0].mxu0 }
 0x14d   : > { %v319_v13 = vpop.f32.mrb[1].mxu0 }
 0x14e   : > { %v897_v14 = vpack.c.bf16 %v855_v12, %v319_v13 }
 0x150   : > { %v858_v15 = vpop.f32.mrb[2].mxu0  ;;  %898 = vmatprep.subr.bf16.mxu1 %v897_v14 }
 0x151   : > { %v329_v16 = vpop.f32.mrb[3].mxu0  ;;  %900 = vmatpush3.bf16.msra.mxu1 %v897_v14 }
 0x152   : > { %v901_v18 = vpack.c.bf16 %v858_v15, %v329_v16 }
 0x154   : > { %v861_v19 = vpop.f32.mrb[4].mxu0  ;;  %870 = vmatmul.mubr.msk.f32.vlgmr.msra.gmra.mrb[0].mxu1 %vm228_vm0, %v217_v17  ;;  %902 = vmatprep.subr.bf16.mxu1 %v901_v18 }
 0x155   : > { %v339_v20 = vpop.f32.mrb[5].mxu0  ;;  %904 = vmatpush3.bf16.msra.mxu1 %v901_v18  ;;  %876 = vmatprep.mubr.msk.f32.mxu1 %vm228_vm0, %v216_v11 }
 0x156   : > { %v905_v21 = vpack.c.bf16 %v861_v19, %v339_v20 }
 0x158   : > { %v864_v22 = vpop.f32.mrb[6].mxu0  ;;  %877 = vmatmul.mubr.msk.f32.vlgmr.msra.gmra.mrb[2].mxu1 %vm228_vm0, %v217_v17  ;;  %906 = vmatprep.subr.bf16.mxu1 %v905_v21 }
 0x159   : > { %v349_v23 = vpop.f32.mrb[7].mxu0  ;;  %908 = vmatpush3.bf16.msra.mxu1 %v905_v21  ;;  %883 = vmatprep.mubr.msk.f32.mxu1 %vm228_vm0, %v216_v11 }
 0x15a   : > { %v909_v24 = vpack.c.bf16 %v864_v22, %v349_v23 }
 0x15c   : > { %884 = vmatmul.mubr.msk.f32.vlgmr.msra.gmra.mrb[4].mxu1 %vm228_vm0, %v217_v17  ;;  %910 = vmatprep.subr.bf16.mxu1 %v909_v24 }
 0x15d   : > { %912 = vmatpush3.bf16.msra.mxu1 %v909_v24  ;;  %890 = vmatprep.mubr.msk.f32.mxu1 %vm228_vm0, %v216_v11 }
 0x160   : > { %891 = vmatmul.mubr.msk.f32.vlgmr.msra.gmra.mrb[6].mxu1 %vm228_vm0, %v217_v17 }
 0x227   : > { %v871_v25 = vpop.f32.mrb[0].mxu1 }
 0x228   : > { %440 = vst.msk [vmem:[%s215_s23 + $0x8] sm:$0xff] %vm228_vm0, %v871_v25  ;;  %v430_v26 = vpop.f32.mrb[1].mxu1 }
 0x229   : > { %439 = vst.msk [vmem:[%s215_s23] sm:$0xff] %vm228_vm0, %v430_v26 }
 0x22b   : > { %v878_v27 = vpop.f32.mrb[2].mxu1 }
 0x22c   : > { %807 = vst.msk [vmem:[%s215_s23 + $0x18] sm:$0xff] %vm228_vm0, %v878_v27  ;;  %v507_v28 = vpop.f32.mrb[3].mxu1 }
 0x22d   : > { %806 = vst.msk [vmem:[%s215_s23 + $0x10] sm:$0xff] %vm228_vm0, %v507_v28 }
 0x22f   : > { %v885_v29 = vpop.f32.mrb[4].mxu1 }
 0x230   : > { %811 = vst.msk [vmem:[%s215_s23 + $0x28] sm:$0xff] %vm228_vm0, %v885_v29  ;;  %v585_v30 = vpop.f32.mrb[5].mxu1 }
 0x231   : > { %810 = vst.msk [vmem:[%s215_s23 + $0x20] sm:$0xff] %vm228_vm0, %v585_v30 }
 0x233   : > { %v892_v31 = vpop.f32.mrb[6].mxu1 }
 0x234   : > { %815 = vst.msk [vmem:[%s215_s23 + $0x38] sm:$0xff] %vm228_vm0, %v892_v31  ;;  %v663_v32 = vpop.f32.mrb[7].mxu1 }
 0x235   : > { %814 = vst.msk [vmem:[%s215_s23 + $0x30] sm:$0xff] %vm228_vm0, %v663_v32 }
 0x236   : > { %1083 = shalt.err (!%p1080_p12)
}
 0x237   : > { %s1084_s7 = scalar_lea.hbm %s1395_s27, 1024  ;;  %s1088_s19 = scalar_lea.hbm %s1446_s3, 2048 }
 0x238   : > { %p1085_p3 = scmp.ne.s32.totalorder %s1395_s27, %s1084_s7  ;;  %p1089_p7 = scmp.lt.u32.totalorder %s1395_s27, %s1446_s3 }
 0x239   : > { %p1090_p9 = scmp.lt.u32.totalorder %s1088_s19, %s1084_s7  ;;  %p1092_p10 = scmp.lt.u32.totalorder %s1084_s7, %s1395_s27 }
 0x23a   : > { %p1086_p6 = pnand %p1085_p3, %p1468_p1 }
 0x23b   : > { %p1091_p8 = por %p1090_p9, %p1089_p7 }
 0x23c   : > { %p1087_p13 = pneg %p1086_p6 }
 0x23d   : > { %p1093_p4 = por %p1092_p10, %p1091_p8 }
 0x23f   : > { %p1094_p0 = pnand %p1093_p4, %p1087_p13 }
 0x241   : > { %1097 = shalt.err (!%p1094_p0)
}
 0x242   : > { %s1152_s5 = smov 128   ;;  %s1153_s29 = smov 8  }
 0x243   : > { %923 = dma.vmem_to_hbm [thread:$0]  (%p1468_p1), %s1389_s22, 1024, %s1395_s27, %s1401_s16, %s1152_s5, %s1152_s5, %s1153_s29  }
 0x244 PF: > { %s704_s23 = sand.u32 1, %s1132_s12   ;;  %p1469_p2 = scmp.ne.s32.totalorder %s1455_s25, 0 }
 0x245   : > { %p1470_p5 = scmp.ge.s32.totalorder %s1144_s15, 2  ;;  %s705_s11 = scalar_lea.sflag [#allocation4], %s704_s23 }
 0x247   : > { %p937_p11 = pnand %p1470_p5, %p1469_p2 }
 0x249   : > { %1127 = dma.done.wait (!%p937_p11), %s705_s11, 1024  }
 0x24a   : > { %1129 = vsyncadd (!%p937_p11), %s705_s11, 4294966272  ;;  %p15_p12 = scmp.ge.s32.totalorder %s1199_s18, 4   ;;  %s1471_s12 = smov %s1136_s13 }
 0x24b   : > { %s1472_s13 = smov %s1140_s14  ;;  %s1473_s14 = smov %s1211_s21 }
 0x24c   : > { %s1474_s15 = smov %s1199_s18  ;;  %17 = sbr.rel (!%p15_p12) target bundleno = 5 (0x5), region = 87 }
 0x253   :  { %710 = vsyncpa [#allocation3], 1 }
 0x254   :  { %712 = vsyncpa [#allocation3 + $0x1], 1 }
 0x255   :  { %713 = vsyncpa [#allocation6], 1 }
 0x256   :  { %714 = vsyncpa [#allocation4], 1 }
 0x257   :  { %716 = vsyncpa [#allocation4 + $0x1], 1 }

</bundles_post_ra>
